<compile_context>
chip_gen: v6e
topology: v6e:2x2x1
jax: 0.10.0
libtpu: 0.0.40
codegen_flags: <defaults>
</compile_context>

<pallas_src>
import functools
import math

import jax
import jax.numpy as jnp
from jax.experimental import pallas as pl
from jax.experimental.pallas import tpu as pltpu


def _make_kernel(K, padding, H, W, Cin, B_TILE):
    """Build the conv kernel for B_TILE batch elements per grid step."""
    HW = H * W
    P = padding * (W + 1)  # zero extension on each side of the flattened axis

    def kernel(x_ref, w_ref, o_ref, patches_ref):
        # x_ref:       (B_TILE, Cin, H*W)        f32   NCHW, spatially flattened
        # w_ref:       (Cout, K*K*Cin)           bf16  fused weight, (kh,kw,cin) minor
        # o_ref:       (B_TILE, Cout, H*W)              channel-major (lane-dense)
        # patches_ref: (K*K*Cin, B_TILE*H*W)     bf16  im2col scratch (VMEM)

        # --- per-kw column-validity masks, computed in-kernel (no HBM input) --
        # column index of each flattened position; hoisted out of all loops so
        # the broadcast is materialized once (JAX does not CSE broadcast_in_dim).
        col = jax.lax.broadcasted_iota(jnp.int32, (Cin, HW), 1) % W
        kw_masks = [((col + (kw - padding)) >= 0) & ((col + (kw - padding)) < W)
                    for kw in range(K)]

        zpad = jnp.zeros((Cin, P), jnp.bfloat16)

        # --- im2col: lane-shifted slices of the zero-extended image ----------
        # Vertical halo -> zero extension; horizontal halo / row wrap -> select.
        # TODO(synk): for large W, a (Cin*H, W)-style layout would turn the kh
        # taps into sublane re-indexing and cut the K^2 arbitrary lane rotations
        # down to K (XLU pressure on v6e/v7x); not worthwhile at W=16.
        for b in range(B_TILE):
            xb = x_ref[b].astype(jnp.bfloat16)                    # (Cin, HW)
            if P > 0:
                xe = jnp.concatenate([zpad, xb, zpad], axis=1)    # (Cin, HW+2P)
            else:
                xe = xb
            for kh in range(K):
                for kw in range(K):
                    off = (kh - padding) * W + (kw - padding) + P
                    patch = xe[:, off:off + HW]       # x[c, h+kh-p, w+kw-p] or 0
                    if kw != padding:                 # only shifted columns wrap
                        patch = jnp.where(kw_masks[kw], patch, 0)
                    tap = kh * K + kw
                    patches_ref[pl.ds(tap * Cin, Cin), pl.ds(b * HW, HW)] = patch

        # --- one fat MXU contraction, bf16 operands, f32 accumulation --------
        acc = jax.lax.dot_general(
            w_ref[...], patches_ref[...],
            dimension_numbers=(((1,), (0,)), ((), ())),
            preferred_element_type=jnp.float32)                   # (Cout, B*HW)

        # Lane-dense per-image stores (no transpose; HW-aligned lane slices).
        for b in range(B_TILE):
            o_ref[b] = acc[:, b * HW:(b + 1) * HW].astype(o_ref.dtype)

    return kernel


def _pick_batch_tile(N, Cin, Cout, KK, HW,
                     out_bytes, bytes_budget=12 * 1024 * 1024, max_tile=8):
    """Largest divisor of N whose per-step VMEM estimate fits the budget."""
    per_image = HW * (Cin * 4 * 2            # x block, f32, double-buffered
                      + Cout * out_bytes * 2  # out block, double-buffered
                      + KK * Cin * 2          # bf16 patches scratch
                      + Cout * 4)             # f32 accumulator
    cap = max(1, min(max_tile, bytes_budget // max(per_image, 1)))
    b = 1
    for d in range(1, N + 1):
        if N % d == 0 and d <= cap:
            b = d
    return b


@functools.partial(jax.jit,
                   static_argnames=("kernel_size", "stride", "padding", "out_dtype"))
def sa_conv_forward(x_nchw, weight_pool, routing_params, scale,
                    kernel_size=3, stride=1, padding=1, out_dtype=None):
    """x_nchw: (N, Cin, H, W); weight_pool: (E, Cout, Cin, K, K)."""
    w1, b1, w2, b2 = routing_params
    N, Cin, H, W = x_nchw.shape
    E, Cout, _, K, _ = weight_pool.shape
    assert K == kernel_size
    assert stride == 1, "kernel implements the module's default stride=1"
    assert K % 2 == 1 and padding == (K - 1) // 2, "same-size conv only (Ho == H)"
    out_dtype = x_nchw.dtype if out_dtype is None else out_dtype

    # --- routing MLP (tiny; plain JAX glue) --------------------------------
    s = jnp.ones((1, 1), jnp.float32) / scale
    inp = jnp.concatenate([s, s], axis=1)                        # (1, 2)
    h = jax.nn.relu(inp @ w1.T + b1)                             # (1, Cin)
    r = jax.nn.softmax(h @ w2.T + b2, axis=1).reshape(E)         # (E,)

    # --- fuse experts ONCE in the wrapper ----------------------------------
    fused_w = jnp.einsum('e,eoikl->oikl', r, weight_pool)        # (Cout, Cin, K, K)
    w_mat = jnp.transpose(fused_w, (0, 2, 3, 1)).reshape(Cout, K * K * Cin)
    w_mat = w_mat.astype(jnp.bfloat16)

    HW = H * W
    x_flat = x_nchw.reshape(N, Cin, HW)          # free reshape; stays NCHW / f32

    out_bytes = jnp.dtype(out_dtype).itemsize
    # VMEM budget ~12 MiB of intermediates keeps us well under the 32 MiB
    # scoped limit (v7x: 64 MiB physical; v5e/v6e: 128 MiB -> could be raised).
    B_TILE = _pick_batch_tile(N, Cin, Cout, K * K, HW, out_bytes)

    kernel = _make_kernel(K, padding, H, W, Cin, B_TILE)

    # Note: the fused-weight block index is constant, so Pallas fetches it once;
    # single-buffering it (pipeline_mode) would only save 2*Cout*K*K*Cin bytes.
    # TODO(synk): for large images add spatial row tiling (grid=(N/B, H/TILE_H))
    # with manually DMA'd halo rows, and mark both grid axes "parallel" (v7x).
    out = pl.pallas_call(
        kernel,
        out_shape=jax.ShapeDtypeStruct((N, Cout, HW), out_dtype),
        grid=(N // B_TILE,),
        in_specs=[
            pl.BlockSpec((B_TILE, Cin, HW), lambda n: (n, 0, 0)),     # activations
            pl.BlockSpec((Cout, K * K * Cin), lambda n: (0, 0)),      # fused weight
        ],
        out_specs=pl.BlockSpec((B_TILE, Cout, HW), lambda n: (n, 0, 0)),
        scratch_shapes=[pltpu.VMEM((K * K * Cin, B_TILE * HW), jnp.bfloat16)],
        compiler_params=pltpu.CompilerParams(
            dimension_semantics=("parallel",),
            vmem_limit_bytes=32 * 1024 * 1024),
    )(x_flat, w_mat)

    return out.reshape(N, Cout, H, W)            # free reshape (already NCHW)


def init_params(key, channels_in, channels_out, kernel_size, num_experts):
    """Deterministic, kaiming-uniform-ish init matching the module's shapes."""
    k1, k2, k3, _, _ = jax.random.split(key, 5)
    # routing: Linear(2 -> Cin), Linear(Cin -> E)
    lim1 = 1.0 / math.sqrt(2)
    w1 = jax.random.uniform(k1, (channels_in, 2), jnp.float32, -lim1, lim1)
    b1 = jnp.zeros((channels_in,), jnp.float32)
    lim2 = 1.0 / math.sqrt(channels_in)
    w2 = jax.random.uniform(k2, (num_experts, channels_in), jnp.float32, -lim2, lim2)
    b2 = jnp.zeros((num_experts,), jnp.float32)
    # weight pool: (E, Cout, Cin, K, K), kaiming_uniform(a=sqrt(5)) bound
    fan_in = channels_in * kernel_size * kernel_size
    bound = math.sqrt(6.0 / ((1 + 5.0) * fan_in))
    weight_pool = jax.random.uniform(
        k3, (num_experts, channels_out, channels_in, kernel_size, kernel_size),
        jnp.float32, -bound, bound)
    # TODO(synk): bias=False path only (module default); bias_pool not implemented.
    return weight_pool, (w1, b1, w2, b2)


if __name__ == "__main__":
    key = jax.random.PRNGKey(0)
    N, Cin, Cout, H, W, K, E = 2, 4, 8, 16, 16, 3, 4
    scale = 2.0

    kx, kp = jax.random.split(key)
    x = jax.random.normal(kx, (N, Cin, H, W), jnp.float32)
    weight_pool, routing_params = init_params(kp, Cin, Cout, K, E)

    out = sa_conv_forward(x, weight_pool, routing_params, scale)
    out = jax.block_until_ready(out)

    # Reference: same routing + fused weight, XLA conv. Operands rounded to
    # bf16 to match the kernel's MXU operand precision (f32 accumulation).
    w1, b1, w2, b2 = routing_params
    s = jnp.ones((1, 1), jnp.float32) / scale
    inp = jnp.concatenate([s, s], axis=1)
    r = jax.nn.softmax(jax.nn.relu(inp @ w1.T + b1) @ w2.T + b2, axis=1).reshape(E)
    fused_w = jnp.einsum('e,eoikl->oikl', r, weight_pool)        # (Cout, Cin, K, K)
    xb = x.astype(jnp.bfloat16).astype(jnp.float32)
    wb = fused_w.astype(jnp.bfloat16).astype(jnp.float32)
    ref = jax.lax.conv_general_dilated(
        xb, wb, window_strides=(1, 1), padding=((1, 1), (1, 1)),
        dimension_numbers=("NCHW", "OIHW", "NCHW"))

    assert out.shape == (N, Cout, H, W)
    err = float(jnp.max(jnp.abs(out - ref)))
    assert err < 2e-3, f"max abs err {err}"

    print("KERNEL_OK")
</pallas_src>

<mosaic_0001>
module attributes {stable_mosaic.version = 11 : i64} {
  func.func @kernel(%arg0: i32, %arg1: memref<2x4x256xf32, #tpu.memory_space<vmem>>, %arg2: memref<8x36xbf16, #tpu.memory_space<vmem>>, %arg3: memref<2x8x256xf32, #tpu.memory_space<vmem>>, %arg4: memref<36x512xbf16, #tpu.memory_space<vmem>>) attributes {dimension_semantics = [#tpu.dimension_semantics<parallel>], iteration_bounds = array<i64: 1>, scalar_prefetch = 0 : i64, scratch_operands = 1 : i64, tpu.core_type = #tpu.core_type<tc>, window_params = [{transform_indices = @transform_0, window_bounds = array<i64: 2, 4, 256>}, {pipeline_mode = #tpu.pipeline_mode<synchronous>, transform_indices = @transform_1, window_bounds = array<i64: 8, 36>}, {transform_indices = @transform_2, window_bounds = array<i64: 2, 8, 256>}]} {
    %0 = tpu.iota {dimensions = array<i32: 1>} : vector<4x256xi32>
    %c16_i32 = arith.constant 16 : i32
    %c0_i32 = arith.constant 0 : i32
    %1 = arith.cmpi eq, %c16_i32, %c0_i32 : i32
    %c1_i32 = arith.constant 1 : i32
    %2 = arith.select %1, %c1_i32, %c16_i32 : i32
    %3 = vector.broadcast %2 : i32 to vector<4x256xi32>
    %4 = arith.remsi %0, %3 : vector<4x256xi32>
    %c0_i32_0 = arith.constant 0 : i32
    %5 = vector.broadcast %c0_i32_0 : i32 to vector<4x256xi32>
    %6 = arith.cmpi ne, %4, %5 : vector<4x256xi32>
    %c0_i32_1 = arith.constant 0 : i32
    %7 = vector.broadcast %c0_i32_1 : i32 to vector<4x256xi32>
    %8 = arith.cmpi slt, %4, %7 : vector<4x256xi32>
    %c0_i32_2 = arith.constant 0 : i32
    %9 = arith.cmpi slt, %2, %c0_i32_2 : i32
    %10 = vector.broadcast %9 : i1 to vector<4x256xi1>
    %11 = vector.broadcast %10 : vector<4x256xi1> to vector<4x256xi1>
    %12 = arith.xori %8, %11 : vector<4x256xi1>
    %13 = arith.andi %12, %6 : vector<4x256xi1>
    %14 = vector.broadcast %2 : i32 to vector<4x256xi32>
    %15 = arith.addi %4, %14 : vector<4x256xi32>
    %16 = arith.select %13, %15, %4 : vector<4x256xi1>, vector<4x256xi32>
    %c-1_i32 = arith.constant -1 : i32
    %17 = vector.broadcast %c-1_i32 : i32 to vector<4x256xi32>
    %18 = arith.addi %16, %17 : vector<4x256xi32>
    %c0_i32_3 = arith.constant 0 : i32
    %19 = vector.broadcast %c0_i32_3 : i32 to vector<4x256xi32>
    %20 = arith.cmpi sge, %18, %19 : vector<4x256xi32>
    %c-1_i32_4 = arith.constant -1 : i32
    %21 = vector.broadcast %c-1_i32_4 : i32 to vector<4x256xi32>
    %22 = arith.addi %16, %21 : vector<4x256xi32>
    %c16_i32_5 = arith.constant 16 : i32
    %23 = vector.broadcast %c16_i32_5 : i32 to vector<4x256xi32>
    %24 = arith.cmpi slt, %22, %23 : vector<4x256xi32>
    %25 = arith.andi %20, %24 : vector<4x256xi1>
    %c1_i32_6 = arith.constant 1 : i32
    %26 = vector.broadcast %c1_i32_6 : i32 to vector<4x256xi32>
    %27 = arith.addi %16, %26 : vector<4x256xi32>
    %c0_i32_7 = arith.constant 0 : i32
    %28 = vector.broadcast %c0_i32_7 : i32 to vector<4x256xi32>
    %29 = arith.cmpi sge, %27, %28 : vector<4x256xi32>
    %c1_i32_8 = arith.constant 1 : i32
    %30 = vector.broadcast %c1_i32_8 : i32 to vector<4x256xi32>
    %31 = arith.addi %16, %30 : vector<4x256xi32>
    %c16_i32_9 = arith.constant 16 : i32
    %32 = vector.broadcast %c16_i32_9 : i32 to vector<4x256xi32>
    %33 = arith.cmpi slt, %31, %32 : vector<4x256xi32>
    %34 = arith.andi %29, %33 : vector<4x256xi1>
    %cst = arith.constant 0.000000e+00 : bf16
    %35 = vector.broadcast %cst : bf16 to vector<4x17xbf16>
    %c0 = arith.constant 0 : index
    %c0_10 = arith.constant 0 : index
    %c0_11 = arith.constant 0 : index
    %36 = vector.load %arg1[%c0, %c0_10, %c0_11] : memref<2x4x256xf32, #tpu.memory_space<vmem>>, vector<1x4x256xf32>
    %37 = vector.shape_cast %36 : vector<1x4x256xf32> to vector<4x256xf32>
    %38 = arith.truncf %37 : vector<4x256xf32> to vector<4x256xbf16>
    %39 = tpu.concatenate %35, %38, %35 in 1 : vector<4x17xbf16>, vector<4x256xbf16>, vector<4x17xbf16> -> vector<4x290xbf16>
    %40 = vector.extract_strided_slice %39 {offsets = [0, 0], sizes = [4, 256], strides = [1, 1]} : vector<4x290xbf16> to vector<4x256xbf16>
    %c0_i32_12 = arith.constant 0 : i32
    %41 = arith.sitofp %c0_i32_12 : i32 to bf16
    %42 = vector.broadcast %41 : bf16 to vector<4x256xbf16>
    %43 = arith.select %25, %40, %42 : vector<4x256xi1>, vector<4x256xbf16>
    %c0_13 = arith.constant 0 : index
    %c0_14 = arith.constant 0 : index
    %44 = vector.load %arg4[%c0_13, %c0_14] : memref<36x512xbf16, #tpu.memory_space<vmem>>, vector<4x256xbf16>
    tpu.vector_store %arg4[%c0_13, %c0_14], %43 {strides = array<i32>} : memref<36x512xbf16, #tpu.memory_space<vmem>>, vector<4x256xbf16>,
    %45 = vector.extract_strided_slice %39 {offsets = [0, 1], sizes = [4, 256], strides = [1, 1]} : vector<4x290xbf16> to vector<4x256xbf16>
    %c4 = arith.constant 4 : index
    %c0_15 = arith.constant 0 : index
    %46 = vector.load %arg4[%c4, %c0_15] : memref<36x512xbf16, #tpu.memory_space<vmem>>, vector<4x256xbf16>
    tpu.vector_store %arg4[%c4, %c0_15], %45 {strides = array<i32>} : memref<36x512xbf16, #tpu.memory_space<vmem>>, vector<4x256xbf16>,
    %47 = vector.extract_strided_slice %39 {offsets = [0, 2], sizes = [4, 256], strides = [1, 1]} : vector<4x290xbf16> to vector<4x256xbf16>
    %c0_i32_16 = arith.constant 0 : i32
    %48 = arith.sitofp %c0_i32_16 : i32 to bf16
    %49 = vector.broadcast %48 : bf16 to vector<4x256xbf16>
    %50 = arith.select %34, %47, %49 : vector<4x256xi1>, vector<4x256xbf16>
    %c8 = arith.constant 8 : index
    %c0_17 = arith.constant 0 : index
    %51 = vector.load %arg4[%c8, %c0_17] : memref<36x512xbf16, #tpu.memory_space<vmem>>, vector<4x256xbf16>
    tpu.vector_store %arg4[%c8, %c0_17], %50 {strides = array<i32>} : memref<36x512xbf16, #tpu.memory_space<vmem>>, vector<4x256xbf16>,
    %52 = vector.extract_strided_slice %39 {offsets = [0, 16], sizes = [4, 256], strides = [1, 1]} : vector<4x290xbf16> to vector<4x256xbf16>
    %c0_i32_18 = arith.constant 0 : i32
    %53 = arith.sitofp %c0_i32_18 : i32 to bf16
    %54 = vector.broadcast %53 : bf16 to vector<4x256xbf16>
    %55 = arith.select %25, %52, %54 : vector<4x256xi1>, vector<4x256xbf16>
    %c12 = arith.constant 12 : index
    %c0_19 = arith.constant 0 : index
    %56 = vector.load %arg4[%c12, %c0_19] : memref<36x512xbf16, #tpu.memory_space<vmem>>, vector<4x256xbf16>
    tpu.vector_store %arg4[%c12, %c0_19], %55 {strides = array<i32>} : memref<36x512xbf16, #tpu.memory_space<vmem>>, vector<4x256xbf16>,
    %57 = vector.extract_strided_slice %39 {offsets = [0, 17], sizes = [4, 256], strides = [1, 1]} : vector<4x290xbf16> to vector<4x256xbf16>
    %c16 = arith.constant 16 : index
    %c0_20 = arith.constant 0 : index
    %58 = vector.load %arg4[%c16, %c0_20] : memref<36x512xbf16, #tpu.memory_space<vmem>>, vector<4x256xbf16>
    tpu.vector_store %arg4[%c16, %c0_20], %57 {strides = array<i32>} : memref<36x512xbf16, #tpu.memory_space<vmem>>, vector<4x256xbf16>,
    %59 = vector.extract_strided_slice %39 {offsets = [0, 18], sizes = [4, 256], strides = [1, 1]} : vector<4x290xbf16> to vector<4x256xbf16>
    %c0_i32_21 = arith.constant 0 : i32
    %60 = arith.sitofp %c0_i32_21 : i32 to bf16
    %61 = vector.broadcast %60 : bf16 to vector<4x256xbf16>
    %62 = arith.select %34, %59, %61 : vector<4x256xi1>, vector<4x256xbf16>
    %c20 = arith.constant 20 : index
    %c0_22 = arith.constant 0 : index
    %63 = vector.load %arg4[%c20, %c0_22] : memref<36x512xbf16, #tpu.memory_space<vmem>>, vector<4x256xbf16>
    tpu.vector_store %arg4[%c20, %c0_22], %62 {strides = array<i32>} : memref<36x512xbf16, #tpu.memory_space<vmem>>, vector<4x256xbf16>,
    %64 = vector.extract_strided_slice %39 {offsets = [0, 32], sizes = [4, 256], strides = [1, 1]} : vector<4x290xbf16> to vector<4x256xbf16>
    %c0_i32_23 = arith.constant 0 : i32
    %65 = arith.sitofp %c0_i32_23 : i32 to bf16
    %66 = vector.broadcast %65 : bf16 to vector<4x256xbf16>
    %67 = arith.select %25, %64, %66 : vector<4x256xi1>, vector<4x256xbf16>
    %c24 = arith.constant 24 : index
    %c0_24 = arith.constant 0 : index
    %68 = vector.load %arg4[%c24, %c0_24] : memref<36x512xbf16, #tpu.memory_space<vmem>>, vector<4x256xbf16>
    tpu.vector_store %arg4[%c24, %c0_24], %67 {strides = array<i32>} : memref<36x512xbf16, #tpu.memory_space<vmem>>, vector<4x256xbf16>,
    %69 = vector.extract_strided_slice %39 {offsets = [0, 33], sizes = [4, 256], strides = [1, 1]} : vector<4x290xbf16> to vector<4x256xbf16>
    %c28 = arith.constant 28 : index
    %c0_25 = arith.constant 0 : index
    %70 = vector.load %arg4[%c28, %c0_25] : memref<36x512xbf16, #tpu.memory_space<vmem>>, vector<4x256xbf16>
    tpu.vector_store %arg4[%c28, %c0_25], %69 {strides = array<i32>} : memref<36x512xbf16, #tpu.memory_space<vmem>>, vector<4x256xbf16>,
    %71 = vector.extract_strided_slice %39 {offsets = [0, 34], sizes = [4, 256], strides = [1, 1]} : vector<4x290xbf16> to vector<4x256xbf16>
    %c0_i32_26 = arith.constant 0 : i32
    %72 = arith.sitofp %c0_i32_26 : i32 to bf16
    %73 = vector.broadcast %72 : bf16 to vector<4x256xbf16>
    %74 = arith.select %34, %71, %73 : vector<4x256xi1>, vector<4x256xbf16>
    %c32 = arith.constant 32 : index
    %c0_27 = arith.constant 0 : index
    %75 = vector.load %arg4[%c32, %c0_27] : memref<36x512xbf16, #tpu.memory_space<vmem>>, vector<4x256xbf16>
    tpu.vector_store %arg4[%c32, %c0_27], %74 {strides = array<i32>} : memref<36x512xbf16, #tpu.memory_space<vmem>>, vector<4x256xbf16>,
    %c1 = arith.constant 1 : index
    %c0_28 = arith.constant 0 : index
    %c0_29 = arith.constant 0 : index
    %76 = vector.load %arg1[%c1, %c0_28, %c0_29] : memref<2x4x256xf32, #tpu.memory_space<vmem>>, vector<1x4x256xf32>
    %77 = vector.shape_cast %76 : vector<1x4x256xf32> to vector<4x256xf32>
    %78 = arith.truncf %77 : vector<4x256xf32> to vector<4x256xbf16>
    %79 = tpu.concatenate %35, %78, %35 in 1 : vector<4x17xbf16>, vector<4x256xbf16>, vector<4x17xbf16> -> vector<4x290xbf16>
    %80 = vector.extract_strided_slice %79 {offsets = [0, 0], sizes = [4, 256], strides = [1, 1]} : vector<4x290xbf16> to vector<4x256xbf16>
    %c0_i32_30 = arith.constant 0 : i32
    %81 = arith.sitofp %c0_i32_30 : i32 to bf16
    %82 = vector.broadcast %81 : bf16 to vector<4x256xbf16>
    %83 = arith.select %25, %80, %82 : vector<4x256xi1>, vector<4x256xbf16>
    %c0_31 = arith.constant 0 : index
    %c256 = arith.constant 256 : index
    %84 = vector.load %arg4[%c0_31, %c256] : memref<36x512xbf16, #tpu.memory_space<vmem>>, vector<4x256xbf16>
    tpu.vector_store %arg4[%c0_31, %c256], %83 {strides = array<i32>} : memref<36x512xbf16, #tpu.memory_space<vmem>>, vector<4x256xbf16>,
    %85 = vector.extract_strided_slice %79 {offsets = [0, 1], sizes = [4, 256], strides = [1, 1]} : vector<4x290xbf16> to vector<4x256xbf16>
    %c4_32 = arith.constant 4 : index
    %c256_33 = arith.constant 256 : index
    %86 = vector.load %arg4[%c4_32, %c256_33] : memref<36x512xbf16, #tpu.memory_space<vmem>>, vector<4x256xbf16>
    tpu.vector_store %arg4[%c4_32, %c256_33], %85 {strides = array<i32>} : memref<36x512xbf16, #tpu.memory_space<vmem>>, vector<4x256xbf16>,
    %87 = vector.extract_strided_slice %79 {offsets = [0, 2], sizes = [4, 256], strides = [1, 1]} : vector<4x290xbf16> to vector<4x256xbf16>
    %c0_i32_34 = arith.constant 0 : i32
    %88 = arith.sitofp %c0_i32_34 : i32 to bf16
    %89 = vector.broadcast %88 : bf16 to vector<4x256xbf16>
    %90 = arith.select %34, %87, %89 : vector<4x256xi1>, vector<4x256xbf16>
    %c8_35 = arith.constant 8 : index
    %c256_36 = arith.constant 256 : index
    %91 = vector.load %arg4[%c8_35, %c256_36] : memref<36x512xbf16, #tpu.memory_space<vmem>>, vector<4x256xbf16>
    tpu.vector_store %arg4[%c8_35, %c256_36], %90 {strides = array<i32>} : memref<36x512xbf16, #tpu.memory_space<vmem>>, vector<4x256xbf16>,
    %92 = vector.extract_strided_slice %79 {offsets = [0, 16], sizes = [4, 256], strides = [1, 1]} : vector<4x290xbf16> to vector<4x256xbf16>
    %c0_i32_37 = arith.constant 0 : i32
    %93 = arith.sitofp %c0_i32_37 : i32 to bf16
    %94 = vector.broadcast %93 : bf16 to vector<4x256xbf16>
    %95 = arith.select %25, %92, %94 : vector<4x256xi1>, vector<4x256xbf16>
    %c12_38 = arith.constant 12 : index
    %c256_39 = arith.constant 256 : index
    %96 = vector.load %arg4[%c12_38, %c256_39] : memref<36x512xbf16, #tpu.memory_space<vmem>>, vector<4x256xbf16>
    tpu.vector_store %arg4[%c12_38, %c256_39], %95 {strides = array<i32>} : memref<36x512xbf16, #tpu.memory_space<vmem>>, vector<4x256xbf16>,
    %97 = vector.extract_strided_slice %79 {offsets = [0, 17], sizes = [4, 256], strides = [1, 1]} : vector<4x290xbf16> to vector<4x256xbf16>
    %c16_40 = arith.constant 16 : index
    %c256_41 = arith.constant 256 : index
    %98 = vector.load %arg4[%c16_40, %c256_41] : memref<36x512xbf16, #tpu.memory_space<vmem>>, vector<4x256xbf16>
    tpu.vector_store %arg4[%c16_40, %c256_41], %97 {strides = array<i32>} : memref<36x512xbf16, #tpu.memory_space<vmem>>, vector<4x256xbf16>,
    %99 = vector.extract_strided_slice %79 {offsets = [0, 18], sizes = [4, 256], strides = [1, 1]} : vector<4x290xbf16> to vector<4x256xbf16>
    %c0_i32_42 = arith.constant 0 : i32
    %100 = arith.sitofp %c0_i32_42 : i32 to bf16
    %101 = vector.broadcast %100 : bf16 to vector<4x256xbf16>
    %102 = arith.select %34, %99, %101 : vector<4x256xi1>, vector<4x256xbf16>
    %c20_43 = arith.constant 20 : index
    %c256_44 = arith.constant 256 : index
    %103 = vector.load %arg4[%c20_43, %c256_44] : memref<36x512xbf16, #tpu.memory_space<vmem>>, vector<4x256xbf16>
    tpu.vector_store %arg4[%c20_43, %c256_44], %102 {strides = array<i32>} : memref<36x512xbf16, #tpu.memory_space<vmem>>, vector<4x256xbf16>,
    %104 = vector.extract_strided_slice %79 {offsets = [0, 32], sizes = [4, 256], strides = [1, 1]} : vector<4x290xbf16> to vector<4x256xbf16>
    %c0_i32_45 = arith.constant 0 : i32
    %105 = arith.sitofp %c0_i32_45 : i32 to bf16
    %106 = vector.broadcast %105 : bf16 to vector<4x256xbf16>
    %107 = arith.select %25, %104, %106 : vector<4x256xi1>, vector<4x256xbf16>
    %c24_46 = arith.constant 24 : index
    %c256_47 = arith.constant 256 : index
    %108 = vector.load %arg4[%c24_46, %c256_47] : memref<36x512xbf16, #tpu.memory_space<vmem>>, vector<4x256xbf16>
    tpu.vector_store %arg4[%c24_46, %c256_47], %107 {strides = array<i32>} : memref<36x512xbf16, #tpu.memory_space<vmem>>, vector<4x256xbf16>,
    %109 = vector.extract_strided_slice %79 {offsets = [0, 33], sizes = [4, 256], strides = [1, 1]} : vector<4x290xbf16> to vector<4x256xbf16>
    %c28_48 = arith.constant 28 : index
    %c256_49 = arith.constant 256 : index
    %110 = vector.load %arg4[%c28_48, %c256_49] : memref<36x512xbf16, #tpu.memory_space<vmem>>, vector<4x256xbf16>
    tpu.vector_store %arg4[%c28_48, %c256_49], %109 {strides = array<i32>} : memref<36x512xbf16, #tpu.memory_space<vmem>>, vector<4x256xbf16>,
    %111 = vector.extract_strided_slice %79 {offsets = [0, 34], sizes = [4, 256], strides = [1, 1]} : vector<4x290xbf16> to vector<4x256xbf16>
    %c0_i32_50 = arith.constant 0 : i32
    %112 = arith.sitofp %c0_i32_50 : i32 to bf16
    %113 = vector.broadcast %112 : bf16 to vector<4x256xbf16>
    %114 = arith.select %34, %111, %113 : vector<4x256xi1>, vector<4x256xbf16>
    %c32_51 = arith.constant 32 : index
    %c256_52 = arith.constant 256 : index
    %115 = vector.load %arg4[%c32_51, %c256_52] : memref<36x512xbf16, #tpu.memory_space<vmem>>, vector<4x256xbf16>
    tpu.vector_store %arg4[%c32_51, %c256_52], %114 {strides = array<i32>} : memref<36x512xbf16, #tpu.memory_space<vmem>>, vector<4x256xbf16>,
    %c0_53 = arith.constant 0 : index
    %c0_54 = arith.constant 0 : index
    %116 = vector.load %arg2[%c0_53, %c0_54] : memref<8x36xbf16, #tpu.memory_space<vmem>>, vector<8x36xbf16>
    %c0_55 = arith.constant 0 : index
    %c0_56 = arith.constant 0 : index
    %117 = vector.load %arg4[%c0_55, %c0_56] : memref<36x512xbf16, #tpu.memory_space<vmem>>, vector<36x512xbf16>
    %cst_57 = arith.constant dense<0.000000e+00> : vector<8x512xf32>
    %118 = tpu.matmul %116, %117, %cst_57 {dimension_numbers = #tpu.dot_dimension_numbers<[1], [0], [0], [1], [0, 0, 1, 1], [], []>} : vector<8x36xbf16>, vector<36x512xbf16>, vector<8x512xf32> -> vector<8x512xf32>
    %119 = vector.extract_strided_slice %118 {offsets = [0, 0], sizes = [8, 256], strides = [1, 1]} : vector<8x512xf32> to vector<8x256xf32>
    %c0_58 = arith.constant 0 : index
    %c0_59 = arith.constant 0 : index
    %c0_60 = arith.constant 0 : index
    %120 = vector.load %arg3[%c0_58, %c0_59, %c0_60] : memref<2x8x256xf32, #tpu.memory_space<vmem>>, vector<1x8x256xf32>
    %121 = vector.shape_cast %120 : vector<1x8x256xf32> to vector<8x256xf32>
    %122 = vector.shape_cast %119 : vector<8x256xf32> to vector<1x8x256xf32>
    tpu.vector_store %arg3[%c0_58, %c0_59, %c0_60], %122 {strides = array<i32>} : memref<2x8x256xf32, #tpu.memory_space<vmem>>, vector<1x8x256xf32>,
    %123 = vector.extract_strided_slice %118 {offsets = [0, 256], sizes = [8, 256], strides = [1, 1]} : vector<8x512xf32> to vector<8x256xf32>
    %c1_61 = arith.constant 1 : index
    %c0_62 = arith.constant 0 : index
    %c0_63 = arith.constant 0 : index
    %124 = vector.load %arg3[%c1_61, %c0_62, %c0_63] : memref<2x8x256xf32, #tpu.memory_space<vmem>>, vector<1x8x256xf32>
    %125 = vector.shape_cast %124 : vector<1x8x256xf32> to vector<8x256xf32>
    %126 = vector.shape_cast %123 : vector<8x256xf32> to vector<1x8x256xf32>
    tpu.vector_store %arg3[%c1_61, %c0_62, %c0_63], %126 {strides = array<i32>} : memref<2x8x256xf32, #tpu.memory_space<vmem>>, vector<1x8x256xf32>,
    return
  }
  func.func @transform_0(%arg0: i32) -> (i32, i32, i32) {
    %c0_i32 = arith.constant 0 : i32
    %c0_i32_0 = arith.constant 0 : i32
    %c0_i32_1 = arith.constant 0 : i32
    return %arg0, %c0_i32, %c0_i32_0 : i32, i32, i32
  }
  func.func @transform_1(%arg0: i32) -> (i32, i32) {
    %c0_i32 = arith.constant 0 : i32
    %c0_i32_0 = arith.constant 0 : i32
    %c0_i32_1 = arith.constant 0 : i32
    return %c0_i32, %c0_i32_0 : i32, i32
  }
  func.func @transform_2(%arg0: i32) -> (i32, i32, i32) {
    %c0_i32 = arith.constant 0 : i32
    %c0_i32_0 = arith.constant 0 : i32
    %c0_i32_1 = arith.constant 0 : i32
    return %arg0, %c0_i32, %c0_i32_0 : i32, i32, i32
  }
}

</mosaic_0001>

<bundles_post_ra>
// kernel: sa_conv_forward.1
= control target key start
LH: loop header
LB: loop body
LE: loop exit
PB: predicated region body
PF: predicated region fallthrough
CT: control target
= control target key end

     0   :  { %v14_v0 = vlaneseq  ;;  %v738_v3 = vmov 0   ;;  %s739_s13 = smov 17   ;;  %s741_s14 = smov 18   ;;  %vm69_vm6 = vcmask 138240   ;;  %vm286_vm9 = vcmask 277504   ;;  %s927_s0 = inlined_call_operand.vmem [shape: f32[2,4,256], index: 0, kind: input, shape index: {}]   ;;  %s928_s1 = inlined_call_operand.vmem [shape: bf16[8,36], index: 1, kind: input, shape index: {}]   ;;  %s929_s2 = inlined_call_operand.vmem [shape: f32[2,8,256], index: 2, kind: output, shape index: {}]  }
   0x1   :  { %v57_v1 = vld [vmem:[%s927_s0] sm:$0xff]  ;;  %v673_v2 = vld [vmem:[%s927_s0 + $0x8] sm:$0xff]  ;;  %601 = vmatprep.mubr.bf16.mxu0 %v738_v3  ;;  %642 = vmatprep.mubr.bf16.mxu1 %v738_v3  ;;  %s740_s0 = smov 34   ;;  %s742_s15 = smov 32   ;;  %vm244_vm13 = vcmask 261120  }
   0x2   :  { %v61_v4 = vpack.c.bf16 %v57_v1, %v57_v1  ;;  %v59_v5 = vcombine.high %v57_v1, %v57_v1  ;;  %v318_v6 = vpack.c.bf16 %v673_v2, %v673_v2  ;;  %v15_v7 = vand.u32 127, %v14_v0  ;;  %s743_s16 = smov 16   ;;  %s744_s17 = smov 2  }
   0x3   :  { %v316_v9 = vcombine.high %v673_v2, %v673_v2  ;;  %v83_v12 = vshrl.u32 %v14_v0, 7  ;;  %s745_s18 = smov 111   ;;  %s746_s19 = smov 95  }
   0x4   :  { %65 = vrot.lane.b32.xlu1 %v61_v4, %s739_s13  ;;  %v62_v8 = vpack.c.bf16 %v59_v5, %v59_v5  ;;  %322 = vrot.lane.b32.xlu0 %v318_v6, %s739_s13  ;;  %v16_v10 = vadd.s32 128, %v15_v7  ;;  %v21_v11 = vand.u32 15, %v15_v7  ;;  %s747_s20 = smov 127   ;;  %s748_s21 = smov 94  }
   0x5   :  { %v319_v16 = vpack.c.bf16 %v316_v9, %v316_v9  ;;  %v84_v19 = vsub.s32 0, %v83_v12  ;;  %v88_v20 = vsub.s32 4, %v83_v12  ;;  %s749_s22 = smov 96   ;;  %s750_s23 = smov 126  }
   0x6   :  { %v28_v13 = vand.u32 15, %v16_v10  ;;  %v49_v14 = vadd.s32 1, %v21_v11  ;;  %v41_v15 = vadd.s32 4294967295, %v21_v11  ;;  %s751_s24 = smov 110   ;;  %s752_s25 = smov 112  }
   0x8   :  { %67 = vrot.lane.b32.xlu1 %v62_v8, %s739_s13  ;;  %v50_v17 = vadd.s32 1, %v28_v13  ;;  %vm53_vm0 = vcmp.lt.s32.totalorder %v49_v14, 16  ;;  %v42_v18 = vadd.s32 4294967295, %v28_v13  ;;  %vm43_vm1 = vcmp.ge.s32.totalorder %v41_v15, 0 }
   0xa   :  { %vm54_vm2 = vcmp.lt.s32.totalorder %v50_v17, 16  ;;  %vm44_vm3 = vcmp.ge.s32.totalorder %v42_v18, 0 }
   0xb   :  { %vm122_vm4 = vmpackc.low %vm54_vm2, %vm53_vm0  ;;  %vm211_vm2 = vcmask 146432  }
   0xc   :  { %324 = vrot.lane.b32.xlu1 %v319_v16, %s739_s13  ;;  %v123_v21 = vsel %vm122_vm4, 65537, %v738_v3  ;;  %vm80_vm5 = vmpackc.low %vm44_vm3, %vm43_vm1  ;;  %vm136_vm1 = vcmask 15360  }
   0xd   :  { %v127_v22 = vrot.slane %v123_v21, %v84_v19  ;;  %v131_v23 = vrot.slane %v123_v21, %v88_v20  ;;  %v81_v24 = vsel %vm80_vm5, 65537, %v738_v3 }
   0xe   :  { %v89_v25 = vrot.slane %v81_v24, %v88_v20  ;;  %v85_v26 = vrot.slane %v81_v24, %v84_v19 }
   0xf   :  { %282 = vrot.lane.b32.xlu0 %v127_v22, %s740_s0 }
  0x10   :  { %209 = vrot.lane.b32.xlu1 %v131_v23, %s741_s14  ;;  %vm91_vm7 = vcmp.ne.s16.totalorder %v89_v25, 0  ;;  %vm90_vm8 = vcmp.ne.s16.totalorder %v85_v26, 0 }
  0x13   :  { %284 = vrot.lane.b32.xlu0 %v131_v23, %s740_s0 }
  0x14   :  { %242 = vrot.lane.b32.xlu1 %v89_v25, %s742_s15 }
  0x17   :  { %207 = vrot.lane.b32.xlu0 %v127_v22, %s741_s14 }
  0x18   :  { %165 = vrot.lane.b32.xlu1 %v89_v25, %s743_s16 }
  0x1b   :  { %240 = vrot.lane.b32.xlu0 %v85_v26, %s742_s15 }
  0x1c   :  { %134 = vrot.lane.b32.xlu1 %v131_v23, %s744_s17 }
  0x1f   :  { %163 = vrot.lane.b32.xlu0 %v85_v26, %s743_s16 }
  0x23   :  { %132 = vrot.lane.b32.xlu0 %v127_v22, %s744_s17 }
  0x76   :  { %v66_v27 = vpop.permute.xlu1 %65  ;;  %v323_v28 = vpop.permute.xlu0 %322 }
  0x77   :  { %v775_v29 = vsel %vm69_vm6, 0, %v66_v27  ;;  %v784_v33 = vsel %vm69_vm6, 0, %v323_v28 }
  0x78   :  { %v92_v34 = vsel %vm90_vm8, %v775_v29, 0  ;;  %v334_v39 = vsel %vm90_vm8, %v784_v33, 0 }
  0x7a   :  { %v68_v30 = vpop.permute.xlu1 %67 }
  0x7b   :  { %v778_v31 = vsel %vm69_vm6, %v66_v27, %v68_v30  ;;  %v781_v32 = vsel %vm69_vm6, %v68_v30, 0 }
  0x7c   :  { %v93_v35 = vsel %vm91_vm7, %v778_v31, 0  ;;  %v662_v36 = vcombine.low %v781_v32, %v781_v32  ;;  %v661_v37 = vcombine.low %v775_v29, %v778_v31 }
  0x7d   :  { %v660_v38 = vcombine.low %v92_v34, %v93_v35 }
  0x7e   :  { %198 = vrot.lane.b32.xlu1 %v662_v36, %s745_s18  ;;  %196 = vrot.lane.b32.xlu0 %v661_v37, %s745_s18  ;;  %v325_v40 = vpop.permute.xlu1 %324  ;;  %v109_v48 = vrot.slane %v662_v36, 6  ;;  %v108_v49 = vrot.slane %v661_v37, 6 }
  0x7f   :  { %100 = vst [vmem:[#allocation2 + $0x18] sm:$0x33] %v660_v38  ;;  %v795_v41 = vsel %vm69_vm6, %v323_v28, %v325_v40  ;;  %v798_v42 = vsel %vm69_vm6, %v325_v40, 0 }
  0x80   :  { %v335_v43 = vsel %vm91_vm7, %v795_v41, 0  ;;  %v676_v44 = vcombine.low %v798_v42, %v798_v42  ;;  %v675_v45 = vcombine.low %v784_v33, %v795_v41 }
  0x81   :  { %v674_v46 = vcombine.low %v334_v39, %v335_v43  ;;  %v283_v47 = vpop.permute.xlu0 %282 }
  0x82   :  { %408 = vrot.lane.b32.xlu1 %v676_v44, %s745_s18  ;;  %406 = vrot.lane.b32.xlu0 %v675_v45, %s745_s18  ;;  %v351_v51 = vrot.slane %v676_v44, 6  ;;  %v350_v52 = vrot.slane %v675_v45, 6  ;;  %v806_v53 = vpop.permute.xlu1 %209  ;;  %vm288_vm12 = vcmp.ne.s16.totalorder %v283_v47, 0 }
  0x83   :  { %342 = vst [vmem:[#allocation2 + $0x8] sm:$0x33] %v674_v46  ;;  %v291_v61 = vsel %vm288_vm12, %v775_v29, 0  ;;  %v470_v4 = vsel %vm288_vm12, %v784_v33, 0  ;;  %vm215_vm6 = vcmp.ne.s16.totalorder %v806_v53, 0 }
  0x84   :  { %v218_v25 = vsel %vm215_vm6, %v781_v32, 0  ;;  %v418_v39 = vsel %vm215_vm6, %v798_v42, 0  ;;  %vm192_vm6 = vcmask 916480  }
  0x85   :  { %v285_v50 = vpop.permute.xlu0 %284  ;;  %v668_v36 = vcombine.low %v218_v25, %v218_v25 }
  0x86   :  { %273 = vrot.lane.b32.xlu1 %v109_v48, %s746_s19  ;;  %271 = vrot.lane.b32.xlu0 %v108_v49, %s746_s19  ;;  %v287_v55 = vsel %vm286_vm9, %v283_v47, %v285_v50  ;;  %vm290_vm10 = vcmp.ne.s16.totalorder %v285_v50, 0  ;;  %v243_v57 = vpop.permute.xlu1 %242  ;;  %vm167_vm9 = vcmask 130048   ;;  %v682_v47 = vcombine.low %v418_v39, %v418_v39 }
  0x87   :  { %vm289_vm11 = vcmp.ne.s16.totalorder %v287_v55, 0  ;;  %v293_v58 = vsel %vm290_vm10, %v781_v32, 0  ;;  %v472_v0 = vsel %vm290_vm10, %v798_v42, 0  ;;  %vm248_vm14 = vcmp.ne.s16.totalorder %v243_v57, 0 }
  0x88   :  { %v292_v59 = vsel %vm289_vm11, %v778_v31, 0  ;;  %v672_v62 = vcombine.low %v293_v58, %v293_v58  ;;  %v471_v3 = vsel %vm289_vm11, %v795_v41, 0  ;;  %v686_v5 = vcombine.low %v472_v0, %v472_v0 }
  0x89   :  { %v808_v54 = vpop.permute.xlu0 %207  ;;  %v671_v2 = vcombine.low %v291_v61, %v292_v59  ;;  %v251_v6 = vsel %vm248_vm14, %v781_v32, 0  ;;  %v685_v8 = vcombine.low %v470_v4, %v471_v3  ;;  %v441_v14 = vsel %vm248_vm14, %v798_v42, 0 }
  0x8a   :  { %462 = vrot.lane.b32.xlu1 %v351_v51, %s746_s19  ;;  %460 = vrot.lane.b32.xlu0 %v350_v52, %s746_s19  ;;  %v820_v1 = vpop.permute.xlu1 %165  ;;  %v670_v12 = vcombine.low %v251_v6, %v251_v6  ;;  %v684_v18 = vcombine.low %v441_v14, %v441_v14  ;;  %v212_v19 = vsel %vm211_vm2, %v808_v54, %v806_v53  ;;  %vm213_vm7 = vcmp.ne.s16.totalorder %v808_v54, 0 }
  0x8b   :  { %vm214_vm8 = vcmp.ne.s16.totalorder %v212_v19, 0  ;;  %v216_v28 = vsel %vm213_vm7, %v775_v29, 0  ;;  %v416_v44 = vsel %vm213_vm7, %v784_v33, 0  ;;  %vm171_vm10 = vcmp.ne.s16.totalorder %v820_v1, 0 }
  0x8c   :  { %v217_v30 = vsel %vm214_vm8, %v778_v31, 0  ;;  %v417_v45 = vsel %vm214_vm8, %v795_v41, 0  ;;  %v228_v46 = vrot.slane %v668_v36, 6  ;;  %v428_v53 = vrot.slane %v682_v47, 6 }
  0x8d   :  { %v241_v56 = vpop.permute.xlu0 %240  ;;  %v667_v40 = vcombine.low %v216_v28, %v217_v30  ;;  %v385_v55 = vsel %vm171_vm10, %v798_v42, 0  ;;  %vm203_vm14 = vcmask 908288   ;;  %vm267_vm2 = vcmask 785408  }
  0x8e   :  { %112 = vrot.lane.b32.xlu1 %v109_v48, %s747_s20  ;;  %110 = vrot.lane.b32.xlu0 %v108_v49, %s747_s20  ;;  %v245_v63 = vsel %vm244_vm13, %v241_v56, %v243_v57  ;;  %vm246_vm15 = vcmp.ne.s16.totalorder %v241_v56, 0  ;;  %v135_v11 = vpop.permute.xlu1 %134  ;;  %v681_v48 = vcombine.low %v416_v44, %v417_v45  ;;  %v174_v49 = vsel %vm171_vm10, %v781_v32, 0 }
  0x8f   :  { %vm247_vm0 = vcmp.ne.s16.totalorder %v245_v63, 0  ;;  %v249_v9 = vsel %vm246_vm15, %v775_v29, 0  ;;  %v439_v16 = vsel %vm246_vm15, %v784_v33, 0  ;;  %vm140_vm3 = vcmp.ne.s16.totalorder %v135_v11, 0 }
  0x90   :  { %v250_v10 = vsel %vm247_vm0, %v778_v31, 0  ;;  %v440_v17 = vsel %vm247_vm0, %v795_v41, 0  ;;  %v143_v21 = vsel %vm140_vm3, %v781_v32, 0  ;;  %v364_v26 = vsel %vm140_vm3, %v798_v42, 0 }
  0x91   :  { %v814_v60 = vpop.permute.xlu0 %163  ;;  %v669_v15 = vcombine.low %v249_v9, %v250_v10  ;;  %v683_v20 = vcombine.low %v439_v16, %v440_v17  ;;  %v664_v24 = vcombine.low %v143_v21, %v143_v21  ;;  %v678_v37 = vcombine.low %v364_v26, %v364_v26 }
  0x92   :  { %354 = vrot.lane.b32.xlu1 %v351_v51, %s747_s20  ;;  %352 = vrot.lane.b32.xlu0 %v350_v52, %s747_s20  ;;  %v168_v38 = vsel %vm167_vm9, %v814_v60, %v820_v1  ;;  %vm169_vm11 = vcmp.ne.s16.totalorder %v814_v60, 0  ;;  %v227_v50 = vrot.slane %v667_v40, 6  ;;  %v666_v54 = vcombine.low %v174_v49, %v174_v49 }
  0x93   :  { %vm170_vm12 = vcmp.ne.s16.totalorder %v168_v38, 0  ;;  %v172_v51 = vsel %vm169_vm11, %v775_v29, 0  ;;  %v427_v57 = vrot.slane %v681_v48, 6  ;;  %v383_v32 = vsel %vm169_vm11, %v784_v33, 0 }
  0x94   :  { %v173_v52 = vsel %vm170_vm12, %v778_v31, 0  ;;  %v680_v58 = vcombine.low %v385_v55, %v385_v55  ;;  %vm116_vm13 = vcmask 1043456   ;;  %vm278_vm15 = vcmask 777216  }
  0x95   :  { %v133_v7 = vpop.permute.xlu0 %132  ;;  %v665_v56 = vcombine.low %v172_v51, %v173_v52  ;;  %vm118_vm0 = vcmask 1039360   ;;  %vm556_vm3 = vcmask 1041408   ;;  %vm552_vm7 = vcmask 293888  }
  0x96   :  { %304 = vrot.lane.b32.xlu1 %v672_v62, %s748_s21  ;;  %302 = vrot.lane.b32.xlu0 %v671_v2, %s748_s21  ;;  %v137_v13 = vsel %vm136_vm1, %v133_v7, %v135_v11  ;;  %vm138_vm4 = vcmp.ne.s16.totalorder %v133_v7, 0  ;;  %v395_v62 = vrot.slane %v680_v58, 6  ;;  %vm309_vm1 = vcmask 769024  }
  0x97   :  { %vm139_vm5 = vcmp.ne.s16.totalorder %v137_v13, 0  ;;  %v141_v22 = vsel %vm138_vm4, %v775_v29, 0  ;;  %v362_v34 = vsel %vm138_vm4, %v784_v33, 0  ;;  %v384_v29 = vsel %vm170_vm12, %v795_v41, 0 }
  0x98   :  { %v142_v23 = vsel %vm139_vm5, %v778_v31, 0  ;;  %v363_v35 = vsel %vm139_vm5, %v795_v41, 0  ;;  %v184_v31 = vrot.slane %v666_v54, 6  ;;  %v679_v59 = vcombine.low %v383_v32, %v384_v29 }
  0x99   :  { %v663_v27 = vcombine.low %v141_v22, %v142_v23  ;;  %v677_v43 = vcombine.low %v362_v34, %v363_v35  ;;  %v183_v61 = vrot.slane %v665_v56, 6  ;;  %vm159_vm4 = vcmask 1031168  }
  0x9a   :  { %483 = vrot.lane.b32.xlu1 %v686_v5, %s748_s21  ;;  %481 = vrot.lane.b32.xlu0 %v685_v8, %s748_s21  ;;  %v394_v42 = vrot.slane %v679_v59, 6  ;;  %vm236_vm5 = vcmask 900096  }
  0x9e   :  { %262 = vrot.lane.b32.xlu1 %v670_v12, %s749_s22  ;;  %260 = vrot.lane.b32.xlu0 %v669_v15, %s749_s22 }
  0xa2   :  { %452 = vrot.lane.b32.xlu1 %v684_v18, %s749_s22  ;;  %450 = vrot.lane.b32.xlu0 %v683_v20, %s749_s22 }
  0xa6   :  { %154 = vrot.lane.b32.xlu1 %v664_v24, %s750_s23  ;;  %152 = vrot.lane.b32.xlu0 %v663_v27, %s750_s23 }
  0xaa   :  { %375 = vrot.lane.b32.xlu1 %v678_v37, %s750_s23  ;;  %373 = vrot.lane.b32.xlu0 %v677_v43, %s750_s23 }
  0xae   :  { %231 = vrot.lane.b32.xlu1 %v228_v46, %s751_s24  ;;  %229 = vrot.lane.b32.xlu0 %v227_v50, %s751_s24 }
  0xb2   :  { %431 = vrot.lane.b32.xlu1 %v428_v53, %s751_s24  ;;  %429 = vrot.lane.b32.xlu0 %v427_v57, %s751_s24 }
  0xb6   :  { %187 = vrot.lane.b32.xlu1 %v184_v31, %s752_s25  ;;  %185 = vrot.lane.b32.xlu0 %v183_v61, %s752_s25 }
  0xba   :  { %398 = vrot.lane.b32.xlu1 %v395_v62, %s752_s25  ;;  %396 = vrot.lane.b32.xlu0 %v394_v42, %s752_s25 }
  0xf0   :  { %v197_v63 = vpop.permute.xlu0 %196  ;;  %v199_v60 = vpop.permute.xlu1 %198 }
  0xf1   :  { %v200_v33 = vrot.slane %v197_v63, 4  ;;  %v201_v0 = vrot.slane %v199_v60, 4 }
  0xf3   :  { %v202_v41 = vsel %vm116_vm13, %v200_v33, %v201_v0 }
  0xf4   :  { %v204_v1 = vsel %vm203_vm14, %v197_v63, %v202_v41  ;;  %v407_v2 = vpop.permute.xlu0 %406  ;;  %v409_v3 = vpop.permute.xlu1 %408 }
  0xf5   :  { %206 = vst [vmem:[#allocation2 + $0x30] sm:$0x33] %v204_v1  ;;  %v410_v4 = vrot.slane %v407_v2, 4  ;;  %v411_v5 = vrot.slane %v409_v3, 4 }
  0xf7   :  { %v412_v6 = vsel %vm116_vm13, %v410_v4, %v411_v5 }
  0xf8   :  { %v413_v7 = vsel %vm203_vm14, %v407_v2, %v412_v6  ;;  %v272_v8 = vpop.permute.xlu0 %271  ;;  %v274_v9 = vpop.permute.xlu1 %273 }
  0xf9   :  { %415 = vst [vmem:[#allocation2 + $0x40] sm:$0x33] %v413_v7  ;;  %v275_v10 = vrot.slane %v272_v8, 4  ;;  %v276_v11 = vrot.slane %v274_v9, 4 }
  0xfb   :  { %v277_v12 = vsel %vm116_vm13, %v275_v10, %v276_v11 }
  0xfc   :  { %v279_v13 = vsel %vm278_vm15, %v272_v8, %v277_v12  ;;  %v461_v14 = vpop.permute.xlu0 %460  ;;  %v463_v15 = vpop.permute.xlu1 %462 }
  0xfd   :  { %281 = vst [vmem:[#allocation2 + $0x20] sm:$0xcc] %v279_v13  ;;  %v464_v16 = vrot.slane %v461_v14, 4  ;;  %v465_v17 = vrot.slane %v463_v15, 4 }
  0xff   :  { %v466_v18 = vsel %vm116_vm13, %v464_v16, %v465_v17 }
 0x100   :  { %v467_v19 = vsel %vm278_vm15, %v461_v14, %v466_v18  ;;  %v113_v20 = vpop.permute.xlu1 %112  ;;  %v111_v21 = vpop.permute.xlu0 %110 }
 0x101   :  { %469 = vst [vmem:[#allocation2 + $0x38] sm:$0xcc] %v467_v19  ;;  %v115_v22 = vrot.slane %v113_v20, 4  ;;  %v114_v23 = vrot.slane %v111_v21, 4 }
 0x103   :  { %v117_v24 = vsel %vm116_vm13, %v114_v23, %v115_v22 }
 0x104   :  { %v355_v25 = vpop.permute.xlu1 %354  ;;  %v119_v26 = vsel %vm118_vm0, %v111_v21, %v117_v24  ;;  %v353_v27 = vpop.permute.xlu0 %352 }
 0x105   :  { %v357_v28 = vrot.slane %v355_v25, 4  ;;  %121 = vst [vmem:[#allocation2 + $0x18] sm:$0xcc] %v119_v26  ;;  %v356_v30 = vrot.slane %v353_v27, 4 }
 0x107   :  { %v358_v34 = vsel %vm116_vm13, %v356_v30, %v357_v28 }
 0x108   :  { %v305_v35 = vpop.permute.xlu1 %304  ;;  %v359_v36 = vsel %vm118_vm0, %v353_v27, %v358_v34  ;;  %v303_v37 = vpop.permute.xlu0 %302 }
 0x109   :  { %v307_v38 = vrot.slane %v305_v35, 4  ;;  %361 = vst [vmem:[#allocation2 + $0x8] sm:$0xcc] %v359_v36  ;;  %v306_v39 = vrot.slane %v303_v37, 4 }
 0x10b   :  { %v308_v40 = vsel %vm116_vm13, %v306_v39, %v307_v38 }
 0x10c   :  { %v484_v43 = vpop.permute.xlu1 %483  ;;  %v310_v44 = vsel %vm309_vm1, %v303_v37, %v308_v40  ;;  %v482_v45 = vpop.permute.xlu0 %481 }
 0x10d   :  { %v486_v46 = vrot.slane %v484_v43, 4  ;;  %312 = vst [vmem:[#allocation2 + $0x48] sm:$0x33] %v310_v44  ;;  %v485_v47 = vrot.slane %v482_v45, 4 }
 0x10f   :  { %v487_v48 = vsel %vm116_vm13, %v485_v47, %v486_v46 }
 0x110   :  { %v263_v49 = vpop.permute.xlu1 %262  ;;  %v488_v50 = vsel %vm309_vm1, %v482_v45, %v487_v48  ;;  %v261_v51 = vpop.permute.xlu0 %260  ;;  %v491_v48 = vld [vmem:[%s928_s1] sm:$0xf] }
 0x111   :  { %v265_v52 = vrot.slane %v263_v49, 4  ;;  %490 = vst [vmem:[#allocation2 + $0x28] sm:$0x33] %v488_v50  ;;  %v264_v53 = vrot.slane %v261_v51, 4 }
 0x113   :  { %v266_v54 = vsel %vm116_vm13, %v264_v53, %v265_v52 }
 0x114   :  { %v453_v55 = vpop.permute.xlu1 %452  ;;  %v268_v56 = vsel %vm267_vm2, %v261_v51, %v266_v54  ;;  %v451_v57 = vpop.permute.xlu0 %450  ;;  %v500_v29 = vld [vmem:[#allocation2 + $0x48] sm:$0x33] }
 0x115   :  { %v455_v32 = vrot.slane %v453_v55, 4  ;;  %270 = vst [vmem:[#allocation2 + $0x20] sm:$0x33] %v268_v56  ;;  %v454_v31 = vrot.slane %v451_v57, 4  ;;  %v696_v58 = vcombine.high %v500_v29, %v500_v29  ;;  %v695_v59 = vcombine.low %v500_v29, %v500_v29 }
 0x117   :  { %v456_v61 = vsel %vm116_vm13, %v454_v31, %v455_v32  ;;  %699 = vmatprep.subr.msk.bf16.mxu0 %vm556_vm3, %v696_v58  ;;  %v558_v62 = vsel %vm556_vm3, %v695_v59, 0 }
 0x118   :  { %v155_v42 = vpop.permute.xlu1 %154  ;;  %v457_v63 = vsel %vm267_vm2, %v451_v57, %v456_v61  ;;  %v153_v60 = vpop.permute.xlu0 %152  ;;  %580 = vmatpush1.bf16.msra.mxu0 %v558_v62  ;;  %v501_v0 = vld [vmem:[#allocation2 + $0x28] sm:$0x33] }
 0x119   :  { %v157_v33 = vrot.slane %v155_v42, 4  ;;  %459 = vst [vmem:[#allocation2 + $0x38] sm:$0x33] %v457_v63  ;;  %v156_v41 = vrot.slane %v153_v60, 4  ;;  %v698_v1 = vcombine.high %v501_v0, %v501_v0  ;;  %v697_v2 = vcombine.low %v501_v0, %v501_v0 }
 0x11b   :  { %v158_v3 = vsel %vm116_vm13, %v156_v41, %v157_v33  ;;  %701 = vmatprep.subr.msk.bf16.mxu1 %vm556_vm3, %v698_v1  ;;  %v564_v4 = vsel %vm556_vm3, %v697_v2, 0 }
 0x11c   :  { %v376_v5 = vpop.permute.xlu1 %375  ;;  %v160_v6 = vsel %vm159_vm4, %v153_v60, %v158_v3  ;;  %v374_v7 = vpop.permute.xlu0 %373  ;;  %621 = vmatpush1.bf16.msra.mxu1 %v564_v4 }
 0x11d   :  { %v378_v8 = vrot.slane %v376_v5, 4  ;;  %162 = vst [vmem:[#allocation2] sm:$0x33] %v160_v6  ;;  %v377_v9 = vrot.slane %v374_v7, 4 }
 0x11f   :  { %v379_v10 = vsel %vm116_vm13, %v377_v9, %v378_v8 }
 0x120   :  { %v232_v11 = vpop.permute.xlu1 %231  ;;  %v380_v12 = vsel %vm159_vm4, %v374_v7, %v379_v10  ;;  %v230_v13 = vpop.permute.xlu0 %229 }
 0x121   :  { %v234_v14 = vrot.slane %v232_v11, 4  ;;  %382 = vst [vmem:[#allocation2 + $0x10] sm:$0x33] %v380_v12  ;;  %v233_v15 = vrot.slane %v230_v13, 4 }
 0x123   :  { %v235_v16 = vsel %vm116_vm13, %v233_v15, %v234_v14 }
 0x124   :  { %v432_v17 = vpop.permute.xlu1 %431  ;;  %v237_v18 = vsel %vm236_vm5, %v230_v13, %v235_v16  ;;  %v430_v19 = vpop.permute.xlu0 %429 }
 0x125   :  { %v434_v20 = vrot.slane %v432_v17, 4  ;;  %239 = vst [vmem:[#allocation2 + $0x30] sm:$0xcc] %v237_v18  ;;  %v433_v21 = vrot.slane %v430_v19, 4 }
 0x127   :  { %v435_v22 = vsel %vm116_vm13, %v433_v21, %v434_v20 }
 0x128   :  { %v188_v23 = vpop.permute.xlu1 %187  ;;  %v436_v24 = vsel %vm236_vm5, %v430_v19, %v435_v22  ;;  %v186_v25 = vpop.permute.xlu0 %185 }
 0x129   :  { %v190_v26 = vrot.slane %v188_v23, 4  ;;  %438 = vst [vmem:[#allocation2 + $0x40] sm:$0xcc] %v436_v24  ;;  %v189_v27 = vrot.slane %v186_v25, 4 }
 0x12b   :  { %v191_v28 = vsel %vm116_vm13, %v189_v27, %v190_v26 }
 0x12c   :  { %v399_v30 = vpop.permute.xlu1 %398  ;;  %v193_v34 = vsel %vm192_vm6, %v186_v25, %v191_v28  ;;  %v397_v35 = vpop.permute.xlu0 %396  ;;  %v726_v37 = vld [vmem:[#allocation2 + $0x34] ss:$-16 sps:$4 sm:$0xff]   ;;  %v728_v38 = vld [vmem:[#allocation2 + $0x30] ss:$-16 sps:$4 sm:$0xff]  }
 0x12d   :  { %v401_v36 = vrot.slane %v399_v30, 4  ;;  %195 = vst [vmem:[#allocation2] sm:$0xcc] %v193_v34  ;;  %v400_v39 = vrot.slane %v397_v35, 4  ;;  %581 = vmatprep.subr.bf16.mxu0 %v726_v37 }
 0x12e   :  { %582 = vmatpush1.bf16.msra.mxu0 %v728_v38 }
 0x12f   :  { %v402_v40 = vsel %vm116_vm13, %v400_v39, %v401_v36 }
 0x130   :  { %v403_v43 = vsel %vm192_vm6, %v397_v35, %v402_v40  ;;  %v729_v44 = vld [vmem:[#allocation2 + $0x44] ss:$-8 sps:$4 sm:$0xff]   ;;  %v731_v45 = vld [vmem:[#allocation2 + $0x40] ss:$-8 sps:$4 sm:$0xff]  }
 0x131   :  { %405 = vst [vmem:[#allocation2 + $0x10] sm:$0xcc] %v403_v43  ;;  %622 = vmatprep.subr.bf16.mxu1 %v729_v44 }
 0x132   :  { %623 = vmatpush1.bf16.msra.mxu1 %v731_v45 }
 0x134   :  { %v732_v46 = vld [vmem:[#allocation2 + $0x1c] ss:$-24 sps:$4 sm:$0xff]   ;;  %v734_v47 = vld [vmem:[#allocation2 + $0x18] ss:$-24 sps:$4 sm:$0xff]  }
 0x135   :  { %583 = vmatprep.subr.bf16.mxu0 %v732_v46 }
 0x136   :  { %584 = vmatpush1.bf16.msra.mxu0 %v734_v47 }
 0x138   :  { %v735_v49 = vld [vmem:[#allocation2 + $0xc] ss:$8 sps:$4 sm:$0xff]   ;;  %v737_v50 = vld [vmem:[#allocation2 + $0x8] ss:$8 sps:$4 sm:$0xff]  }
 0x139   :  { %700 = vmatmul.mubr.msk.bf16.vlgmr.msra.gmra.mxu0 %vm552_vm7, %v491_v48  ;;  %624 = vmatprep.subr.bf16.mxu1 %v735_v49 }
 0x13a   :  { %625 = vmatpush1.bf16.msra.mxu1 %v737_v50 }
 0x13d   :  { %702 = vmatmul.mubr.msk.bf16.vlgmr.msra.gmra.mxu1 %vm552_vm7, %v491_v48 }
 0x1f9   :  { %v603_v51 = vpop.f32.mrf.mxu0 }
 0x1fa   :  { %651 = vst [vmem:[%s929_s2] sm:$0xff] %v603_v51 }
 0x1fb   :  { %v605_v52 = vpop.f32.mrf.mxu0 }
 0x1fc   :  { %652 = vst [vmem:[%s929_s2 + $0x8] sm:$0xff] %v605_v52 }
 0x1fd   :  { %v607_v53 = vpop.f32.mrf.mxu0  ;;  %v644_v54 = vpop.f32.mrf.mxu1 }
 0x1fe   :  { %703 = vst [vmem:[%s929_s2 + $0x10] sm:$0xff] %v644_v54 }
 0x1ff   :  { %v608_v55 = vpop.f32.mrf.mxu0  ;;  %v646_v56 = vpop.f32.mrf.mxu1 }
 0x200   :  { %704 = vst [vmem:[%s929_s2 + $0x18] sm:$0xff] %v646_v56 }
 0x201   :  { %v648_v57 = vpop.f32.mrf.mxu1 }
 0x203   :  { %v649_v32 = vpop.f32.mrf.mxu1 }

</bundles_post_ra>
